<compile_context>
chip_gen: v7x
topology: tpu7x:2x2x1
jax: 0.10.0
libtpu: 0.0.40
codegen_flags: <defaults>
</compile_context>

<pallas_src>
import functools

import jax
import jax.numpy as jnp
from jax.experimental import pallas as pl
from jax.experimental.pallas import tpu as pltpu


# --------------------------------------------------------------------------- #
# Kernel
# --------------------------------------------------------------------------- #
def _qadd_kernel(a_scale_ref, b_scale_ref, a_ref, b_ref, o_ref, *, qmin, qmax):
    """Elementwise hot path: scale-by-power-of-two, add, floor, clamp."""
    sa = a_scale_ref[0]                       # 2^a_shift  (scalar, SMEM)
    sb = b_scale_ref[0]                       # 2^b_shift  (scalar, SMEM)
    a = a_ref[...].astype(jnp.float32)        # in-kernel cast (inputs keep native dtype)
    b = b_ref[...].astype(jnp.float32)
    # TODO(synk): emit int8 output (post-clip range is exactly [-128,127]) if the
    # consumer contract allows -> 4x less write bandwidth; module contract is f32.
    o_ref[...] = jnp.clip(jnp.floor(a * sa + b * sb), qmin, qmax)


@functools.partial(jax.jit, static_argnames=("tm", "qmin", "qmax"))
def _qadd_2d(a2d, b2d, a_scale, b_scale, *, tm, qmin, qmax):
    m, n = a2d.shape
    grid = (pl.cdiv(m, tm),)                  # ragged last block handled by Pallas

    # vmem_limit tracks the real double-buffered footprint (+50% slack + 2 MiB).
    bytes_in = tm * n * a2d.dtype.itemsize
    bytes_out = tm * n * 4
    footprint = 2 * (2 * bytes_in + bytes_out)          # 2 bufs x (2 in + 1 out)
    vmem_limit = min(max(int(footprint * 1.5) + (2 << 20), 16 << 20), 100 << 20)

    kernel = functools.partial(_qadd_kernel, qmin=qmin, qmax=qmax)
    return pl.pallas_call(
        kernel,
        out_shape=jax.ShapeDtypeStruct((m, n), jnp.float32),
        grid=grid,
        in_specs=[
            pl.BlockSpec(memory_space=pltpu.SMEM),        # a_scale (1,)
            pl.BlockSpec(memory_space=pltpu.SMEM),        # b_scale (1,)
            pl.BlockSpec((tm, n), lambda i: (i, 0)),      # a tile (native dtype)
            pl.BlockSpec((tm, n), lambda i: (i, 0)),      # b tile (native dtype)
        ],
        out_specs=pl.BlockSpec((tm, n), lambda i: (i, 0)),
        compiler_params=pltpu.CompilerParams(
            dimension_semantics=("parallel",),
            vmem_limit_bytes=vmem_limit,
        ),
        # TODO(synk): sweep pipeline_mode=pl.Buffered(3) on the tensor streams for
        # v7x (low single-digit % win); kept at default depth 2 for portability.
    )(a_scale, b_scale, a2d, b2d)


# --------------------------------------------------------------------------- #
# Layout helpers (all Python/trace-time; shapes are static)
# --------------------------------------------------------------------------- #
_BLOCK_TARGET_BYTES = 4 * 1024 * 1024        # ~4 MiB per stream per block (f32)


def _round_up(x, m):
    return ((x + m - 1) // m) * m


def _num_tensorcores():
    """1 for single-TC chips (v5e/v6e); 2 otherwise (v4/v5p/v7x). Safe default 2."""
    try:
        kind = jax.devices()[0].device_kind.lower()
    except Exception:
        return 2
    for single_tc in ("v5 lite", "v5e", "v5litepod", "v6 lite", "v6e", "trillium"):
        if single_tc in kind:
            return 1
    return 2


def _choose_lanes(total):
    """Widest lane count (multiple of 128) that divides `total` with >= 8 rows."""
    for lanes in (1024, 512, 256, 128):
        if total % lanes == 0 and total // lanes >= 8:
            return lanes
    return 128


def _choose_tm(rows, lanes, ntc):
    """Rows per block: biggest block within the ~4 MiB/stream budget.

    On multi-TensorCore parts keep >= 4 grid steps so the 'parallel' axis can be
    sharded across both cores; on single-TC parts take the largest block (a grid
    of 1-2 steps is fine and amortizes the ~0.35 us per-step overhead best).
    """
    cap = max(8, (_BLOCK_TARGET_BYTES // (lanes * 4)) // 8 * 8)
    if ntc > 1:
        cap = min(cap, max(8, _round_up(-(-rows // 4), 8)))
    if rows <= cap:
        return rows            # full-extent row block is always a legal block dim
    return cap                 # multiple of 8; ragged edge block masked by Pallas


# --------------------------------------------------------------------------- #
# Module wrapper
# --------------------------------------------------------------------------- #
class PallasAdd:
    """JAX/Pallas equivalent of the `Add` module (inference path).

    Deterministic parameter initialization (size=(1,), 8-bit symmetric quant):
      delta_out = 2^-4  =>  rexp_out = -4.0
      qmin = -2^(bits-1) = -128, qmax = 2^(bits-1) - 1 = 127
    """

    def __init__(self, size=(1,), bits=8):
        self.size = size
        self.rexp_out = jnp.full(size, -4.0, dtype=jnp.float32)   # log2(delta_out)
        self.qmin = float(-(2 ** (bits - 1)))
        self.qmax = float(2 ** (bits - 1) - 1)
        # buffers (filled during forward, mirroring the PyTorch module)
        self.a_shift = jnp.zeros(size, dtype=jnp.float32)
        self.b_shift = jnp.zeros(size, dtype=jnp.float32)

    def __call__(self, a_val, a_rexp, b_val, b_rexp):
        assert a_val.shape == b_val.shape, "ADD: input shapes not identical"
        rexp = self.rexp_out  # log2(delta_out)

        # Glue: shift / scale computation (scalar, size=(1,)).
        # TODO(synk): per-channel (size=(C,)) scales would need a lane-broadcast
        # layout; only the default scalar size=(1,) path is implemented.
        self.a_shift = jnp.round(a_rexp.astype(jnp.float32) - rexp)
        self.b_shift = jnp.round(b_rexp.astype(jnp.float32) - rexp)
        a_scale = jnp.exp2(self.a_shift).reshape(-1)[:1].astype(jnp.float32)
        b_scale = jnp.exp2(self.b_shift).reshape(-1)[:1].astype(jnp.float32)

        shape = a_val.shape
        total = a_val.size
        lanes = _choose_lanes(total)
        rows = total // lanes
        main = rows * lanes
        tail = total - main          # < 128; nonzero only for non-128-aligned sizes

        a_flat = a_val.reshape(-1)   # native dtype; cast happens inside the kernel
        b_flat = b_val.reshape(-1)

        pieces = []
        if rows > 0:
            tm = _choose_tm(rows, lanes, _num_tensorcores())
            a2d = (a_flat if tail == 0 else a_flat[:main]).reshape(rows, lanes)
            b2d = (b_flat if tail == 0 else b_flat[:main]).reshape(rows, lanes)
            out_main = _qadd_2d(a2d, b2d, a_scale, b_scale,
                                tm=tm, qmin=self.qmin, qmax=self.qmax)
            pieces.append(out_main.reshape(-1))
        if tail > 0:
            # Tiny (<128 element) jnp epilogue for the sub-lane tail; avoids padding
            # (and an extra full HBM pass over) the whole tensor.
            at = a_flat[main:].astype(jnp.float32)
            bt = b_flat[main:].astype(jnp.float32)
            pieces.append(jnp.clip(jnp.floor(at * a_scale[0] + bt * b_scale[0]),
                                   self.qmin, self.qmax))
        out = pieces[0] if len(pieces) == 1 else jnp.concatenate(pieces)
        return out.reshape(shape), rexp
        # TODO(synk): training path (fake-quant LinQuantExpScale with running
        # statistics) is stateful calibration, not a TPU hot path; omitted.


# --------------------------------------------------------------------------- #
# Reference + self-test
# --------------------------------------------------------------------------- #
def _reference(a_val, a_rexp, b_val, b_rexp, rexp_out, qmin, qmax):
    a_shift = jnp.round(a_rexp - rexp_out)
    b_shift = jnp.round(b_rexp - rexp_out)
    va = a_val.astype(jnp.float32) * jnp.exp2(a_shift)
    vb = b_val.astype(jnp.float32) * jnp.exp2(b_shift)
    return jnp.clip(jnp.floor(va + vb), qmin, qmax)


if __name__ == "__main__":
    key = jax.random.PRNGKey(0)
    k1, k2, k3, k4, k5, k6 = jax.random.split(key, 6)

    mod = PallasAdd(size=(1,), bits=8)
    a_rexp = jnp.full((1,), -3.0, dtype=jnp.float32)   # log2 of a's quant step
    b_rexp = jnp.full((1,), -5.0, dtype=jnp.float32)   # log2 of b's quant step

    # Case 1: aligned NCHW demo shape (2048 elements -> lane-aligned slab, no pad).
    N, C, H, W = 2, 4, 16, 16
    a_val = jnp.round(jax.random.uniform(k1, (N, C, H, W), minval=-100, maxval=100))
    b_val = jnp.round(jax.random.uniform(k2, (N, C, H, W), minval=-100, maxval=100))
    out, rexp = mod(a_val, a_rexp, b_val, b_rexp)
    out = jax.block_until_ready(out)
    ref = _reference(a_val, a_rexp, b_val, b_rexp, mod.rexp_out, mod.qmin, mod.qmax)
    assert out.shape == (N, C, H, W)
    assert jnp.allclose(out, ref), "mismatch vs reference (aligned case)"

    # Case 2: non-aligned shape -> ragged row block + sub-lane tail epilogue.
    shp = (3, 5, 7, 11)   # 1155 elements, not a multiple of 128
    a_val2 = jnp.round(jax.random.uniform(k3, shp, minval=-100, maxval=100))
    b_val2 = jnp.round(jax.random.uniform(k4, shp, minval=-100, maxval=100))
    out2, _ = mod(a_val2, a_rexp, b_val2, b_rexp)
    out2 = jax.block_until_ready(out2)
    ref2 = _reference(a_val2, a_rexp, b_val2, b_rexp, mod.rexp_out, mod.qmin, mod.qmax)
    assert out2.shape == shp
    assert jnp.allclose(out2, ref2), "mismatch vs reference (ragged/tail case)"

    # Case 3: lane-aligned but row-ragged shape, bf16 inputs (in-kernel upcast).
    shp3 = (2, 8, 56, 56)   # 50176 elements = 49 * 1024 lanes
    a_val3 = jnp.round(jax.random.uniform(k5, shp3, minval=-100, maxval=100)).astype(jnp.bfloat16)
    b_val3 = jnp.round(jax.random.uniform(k6, shp3, minval=-100, maxval=100)).astype(jnp.bfloat16)
    out3, _ = mod(a_val3, a_rexp, b_val3, b_rexp)
    out3 = jax.block_until_ready(out3)
    ref3 = _reference(a_val3, a_rexp, b_val3, b_rexp, mod.rexp_out, mod.qmin, mod.qmax)
    assert out3.shape == shp3
    assert jnp.allclose(out3, ref3), "mismatch vs reference (bf16 / ragged rows case)"

    print("KERNEL_OK")
</pallas_src>

<mosaic_0001>
module attributes {stable_mosaic.version = 11 : i64} {
  func.func @_qadd_kernel(%arg0: i32, %arg1: memref<1xf32, #tpu.memory_space<smem>>, %arg2: memref<1xf32, #tpu.memory_space<smem>>, %arg3: memref<8x256xf32, #tpu.memory_space<vmem>>, %arg4: memref<8x256xf32, #tpu.memory_space<vmem>>, %arg5: memref<8x256xf32, #tpu.memory_space<vmem>>) attributes {dimension_semantics = [#tpu.dimension_semantics<parallel>], iteration_bounds = array<i64: 1>, scalar_prefetch = 0 : i64, scratch_operands = 0 : i64, tpu.core_type = #tpu.core_type<tc>, window_params = [{transform_indices = @transform_0, window_bounds = array<i64: 1>}, {transform_indices = @transform_1, window_bounds = array<i64: 1>}, {transform_indices = @transform_2, window_bounds = array<i64: 8, 256>}, {transform_indices = @transform_3, window_bounds = array<i64: 8, 256>}, {transform_indices = @transform_4, window_bounds = array<i64: 8, 256>}]} {
    %c0 = arith.constant 0 : index
    %0 = memref.load %arg1[%c0] : memref<1xf32, #tpu.memory_space<smem>>
    %c0_0 = arith.constant 0 : index
    %1 = memref.load %arg2[%c0_0] : memref<1xf32, #tpu.memory_space<smem>>
    %c0_1 = arith.constant 0 : index
    %c0_2 = arith.constant 0 : index
    %2 = vector.load %arg3[%c0_1, %c0_2] : memref<8x256xf32, #tpu.memory_space<vmem>>, vector<8x256xf32>
    %c0_3 = arith.constant 0 : index
    %c0_4 = arith.constant 0 : index
    %3 = vector.load %arg4[%c0_3, %c0_4] : memref<8x256xf32, #tpu.memory_space<vmem>>, vector<8x256xf32>
    %4 = vector.broadcast %0 : f32 to vector<8x256xf32>
    %5 = arith.mulf %2, %4 : vector<8x256xf32>
    %6 = vector.broadcast %1 : f32 to vector<8x256xf32>
    %7 = arith.mulf %3, %6 : vector<8x256xf32>
    %8 = arith.addf %5, %7 : vector<8x256xf32>
    %9 = math.floor %8 : vector<8x256xf32>
    %cst = arith.constant -1.280000e+02 : f32
    %cst_5 = arith.constant 1.270000e+02 : f32
    %10 = vector.broadcast %cst : f32 to vector<8x256xf32>
    %11 = arith.maximumf %10, %9 : vector<8x256xf32>
    %12 = vector.broadcast %cst_5 : f32 to vector<8x256xf32>
    %13 = arith.minimumf %12, %11 : vector<8x256xf32>
    %c0_6 = arith.constant 0 : index
    %c0_7 = arith.constant 0 : index
    %14 = vector.load %arg5[%c0_6, %c0_7] : memref<8x256xf32, #tpu.memory_space<vmem>>, vector<8x256xf32>
    tpu.vector_store %arg5[%c0_6, %c0_7], %13 {strides = array<i32>} : memref<8x256xf32, #tpu.memory_space<vmem>>, vector<8x256xf32>,
    return
  }
  func.func @transform_0(%arg0: i32) -> i32 {
    %c0_i32 = arith.constant 0 : i32
    %c0_i32_0 = arith.constant 0 : i32
    return %c0_i32 : i32
  }
  func.func @transform_1(%arg0: i32) -> i32 {
    %c0_i32 = arith.constant 0 : i32
    %c0_i32_0 = arith.constant 0 : i32
    return %c0_i32 : i32
  }
  func.func @transform_2(%arg0: i32) -> (i32, i32) {
    %c0_i32 = arith.constant 0 : i32
    %c0_i32_0 = arith.constant 0 : i32
    return %arg0, %c0_i32 : i32, i32
  }
  func.func @transform_3(%arg0: i32) -> (i32, i32) {
    %c0_i32 = arith.constant 0 : i32
    %c0_i32_0 = arith.constant 0 : i32
    return %arg0, %c0_i32 : i32, i32
  }
  func.func @transform_4(%arg0: i32) -> (i32, i32) {
    %c0_i32 = arith.constant 0 : i32
    %c0_i32_0 = arith.constant 0 : i32
    return %arg0, %c0_i32 : i32, i32
  }
}

</mosaic_0001>

<bundles_post_ra>
// kernel: _qadd_2d.1
= control target key start
LH: loop header
LB: loop body
LE: loop exit
PB: predicated region body
PF: predicated region fallthrough
CT: control target
= control target key end

     0   :  { %11 = vsyncpa [#allocation5], 0  ;;  %s227_s0 = inlined_call_operand.<no memory space> [shape: f32[1], index: 0, kind: input, shape index: {}]   ;;  %s228_s1 = inlined_call_operand.<no memory space> [shape: f32[1], index: 1, kind: input, shape index: {}]   ;;  %s229_s2 = inlined_call_operand.hbm [shape: f32[8,256], index: 2, kind: input, shape index: {}]   ;;  %s230_s3 = inlined_call_operand.hbm [shape: f32[8,256], index: 3, kind: input, shape index: {}]   ;;  %s231_s4 = inlined_call_operand.hbm [shape: f32[8,256], index: 4, kind: output, shape index: {}]  }
   0x1   :  { %12 = vsyncpa [#allocation8], 0 }
   0x2   :  { %13 = vsyncpa [#allocation6], 0  ;;  %s157_s15 = smov [#allocation4]   ;;  %s158_s17 = smov [#allocation7]  }
   0x3   :  { %s24_s16 = sshll.u32 %s157_s15, 4  ;;  %s34_s18 = sshll.u32 %s158_s17, 4  ;;  %s25_s16 = int_to_ptr.vmem [resolvable:$true] %s24_s16  ;;  %s35_s18 = int_to_ptr.vmem [resolvable:$true] %s34_s18 }
   0x4   :  { %s85_s21 = scalar_lea.hbm %s229_s2, 256 }
   0x5   :  { %p86_p0 = scmp.ne.s32.totalorder %s229_s2, %s85_s21  ;;  %p89_p1 = scmp.lt.u32.totalorder %s85_s21, %s229_s2 }
   0x7   :  { %p91_p2 = pnand %p89_p1, %p86_p0 }
   0x9   :  { %94 = shalt.err (!%p91_p2)
}
   0xa   :  { %s95_s26 = scalar_lea.vmem %s25_s16, 256  ;;  %p100_p4 = scmp.lt.s32.totalorder %s25_s16, %s25_s16 }
   0xb   :  { %p96_p3 = scmp.ne.s32.totalorder %s25_s16, %s95_s26  ;;  %p101_p5 = scmp.lt.s32.totalorder %s95_s26, %s95_s26 }
   0xd   :  { %p102_p6 = por %p101_p5, %p100_p4 }
   0xf   :  { %p103_p7 = pnand %p102_p6, %p96_p3 }
  0x11   :  { %106 = shalt.err (!%p103_p7)
}
  0x12   :  { %27 = dma.hbm_to_vmem [thread:$0]  %s229_s2, 256, %s25_s16, [#allocation5]  }
  0x13   :  { %s107_s5 = scalar_lea.hbm %s230_s3, 256 }
  0x14   :  { %p108_p8 = scmp.ne.s32.totalorder %s230_s3, %s107_s5  ;;  %p111_p9 = scmp.lt.u32.totalorder %s107_s5, %s230_s3 }
  0x16   :  { %p113_p10 = pnand %p111_p9, %p108_p8 }
  0x18   :  { %116 = shalt.err (!%p113_p10)
}
  0x19   :  { %s117_s10 = scalar_lea.vmem %s35_s18, 256  ;;  %p122_p12 = scmp.lt.s32.totalorder %s35_s18, %s35_s18 }
  0x1a   :  { %p118_p11 = scmp.ne.s32.totalorder %s35_s18, %s117_s10  ;;  %p123_p13 = scmp.lt.s32.totalorder %s117_s10, %s117_s10 }
  0x1c   :  { %p124_p0 = por %p123_p13, %p122_p12 }
  0x1e   :  { %p125_p1 = pnand %p124_p0, %p118_p11 }
  0x20   :  { %128 = shalt.err (!%p125_p1)
}
  0x21   :  { %37 = dma.hbm_to_vmem [thread:$0]  %s230_s3, 256, %s35_s18, [#allocation8]  }
  0x22   :  { %151 = dma.done.wait [#allocation5], 256  }
  0x23   :  { %152 = vsyncadd [#allocation5], 4294967040 }
  0x24   :  { %153 = dma.done.wait [#allocation8], 256  }
  0x25   :  { %154 = vsyncadd [#allocation8], 4294967040  ;;  %v50_v0 = vstv %s227_s0  ;;  %v53_v1 = vstv %s228_s1  ;;  %v46_v2 = vld [vmem:[#allocation4] sm:$0xff]  ;;  %v48_v3 = vld [vmem:[#allocation7] sm:$0xff]  ;;  %s159_s3 = smov [#allocation9]  }
  0x26   :  { %v47_v4 = vld [vmem:[#allocation4 + $0x8] sm:$0xff]  ;;  %v51_v5 = vmul.f32 %v50_v0, %v46_v2  ;;  %v54_v6 = vmul.f32 %v53_v1, %v48_v3  ;;  %v49_v7 = vld [vmem:[#allocation7 + $0x8] sm:$0xff]  ;;  %s72_s16 = sshll.u32 %s159_s3, 4  ;;  %s73_s16 = int_to_ptr.vmem [resolvable:$true] %s72_s16 }
  0x27   :  { %v52_v8 = vmul.f32 %v50_v0, %v47_v4  ;;  %v55_v9 = vmul.f32 %v53_v1, %v49_v7  ;;  %s129_s0 = scalar_lea.vmem %s73_s16, 256  ;;  %p134_p3 = scmp.lt.s32.totalorder %s73_s16, %s73_s16 }
  0x28   :  { %v56_v10 = vadd.f32 %v54_v6, %v51_v5  ;;  %p130_p2 = scmp.ne.s32.totalorder %s73_s16, %s129_s0  ;;  %p135_p4 = scmp.lt.s32.totalorder %s129_s0, %s129_s0 }
  0x29   :  { %v57_v11 = vadd.f32 %v55_v9, %v52_v8 }
  0x2a   :  { %v58_v12 = vfloor.f32 %v56_v10  ;;  %p136_p5 = por %p135_p4, %p134_p3 }
  0x2b   :  { %v59_v13 = vfloor.f32 %v57_v11 }
  0x2c   :  { %v60_v14 = vmax.f32 %v58_v12, -128.0  ;;  %p137_p6 = pnand %p136_p5, %p130_p2 }
  0x2d   :  { %v61_v15 = vmax.f32 %v59_v13, -128.0 }
  0x2e   :  { %v62_v16 = vmin.f32 %v60_v14, 127.0 }
  0x2f   :  { %v63_v17 = vmin.f32 %v61_v15, 127.0 }
  0x30   :  { %64 = vst [vmem:[#allocation9] sm:$0xff] %v62_v16 }
  0x31   :  { %65 = vst [vmem:[#allocation9 + $0x8] sm:$0xff] %v63_v17 }
  0x32   :  { %140 = shalt.err (!%p137_p6)
}
  0x33   :  { %s141_s18 = scalar_lea.hbm %s231_s4, 256 }
  0x34   :  { %p142_p7 = scmp.ne.s32.totalorder %s231_s4, %s141_s18  ;;  %p145_p8 = scmp.lt.u32.totalorder %s141_s18, %s231_s4 }
  0x36   :  { %p147_p9 = pnand %p145_p8, %p142_p7 }
  0x38   :  { %150 = shalt.err (!%p147_p9)
}
  0x39   :  { %75 = dma.vmem_to_hbm [thread:$0]  %s73_s16, 256, %s231_s4, [#allocation6]  }
  0x3a   :  { %155 = dma.done.wait [#allocation6], 256  }
  0x3b   :  { %156 = vsyncadd [#allocation6], 4294967040 }
  0x3c   :  { %79 = vsyncpa [#allocation5], 1 }
  0x3d   :  { %80 = vsyncpa [#allocation8], 1 }
  0x3e   :  { %81 = vsyncpa [#allocation6], 1 }

</bundles_post_ra>
